<compile_context>
chip_gen: v7x
topology: tpu7x:2x2x1
jax: 0.10.0
libtpu: 0.0.40
codegen_flags: <defaults>
</compile_context>

<pallas_src>
import functools

import jax
import jax.numpy as jnp
from jax import lax
from jax.experimental import pallas as pl
from jax.experimental.pallas import tpu as pltpu


def _round_up(n, m):
    return ((n + m - 1) // m) * m


# ---------------------------------------------------------------------------
# Kernel
# ---------------------------------------------------------------------------
def encoder_kernel(x_ref, w1_ref, b1_ref, wh_ref, bh_ref, o_ref, *, z_dim):
    """One batch tile of:
         h          = tanh(x @ W1 + b1)
         [mu | sig] = h @ [Wmu || Wsig] + [bmu || bsig];  exp() on sigma lanes.

    x / weights arrive already padded and pre-cast to the MXU input dtype
    (done once in the wrapper); accumulation, tanh and exp stay in f32
    (v5e has no bf16 VPU/EUP).
    """
    h = jnp.tanh(
        jnp.dot(x_ref[...], w1_ref[...], preferred_element_type=jnp.float32)
        + b1_ref[...]
    )
    h = h.astype(wh_ref.dtype)  # no-op on the f32 path

    y = (jnp.dot(h, wh_ref[...], preferred_element_type=jnp.float32)
         + bh_ref[...])

    # Sigma-column mask as a single (1, N) row (broadcast over the batch by
    # jnp.where) instead of a full (tb, N) iota per tile.  Non-sigma lanes are
    # clamped to 0 before exp so no spurious inf/NaN is produced on mu /
    # padding lanes; the select keeps the output exact.
    col = lax.broadcasted_iota(jnp.int32, (1, y.shape[1]), 1)
    is_sigma = (col >= z_dim) & (col < 2 * z_dim)
    o_ref[...] = jnp.where(is_sigma, jnp.exp(jnp.where(is_sigma, y, 0.0)), y)


# ---------------------------------------------------------------------------
# One-time parameter preparation (hoisted out of the per-call wrapper)
# ---------------------------------------------------------------------------
def prepare_params(params, *, mxu_dtype=None):
    """Pad feature dims to 128-lane multiples, fuse the [Wmu || Wsig] head,
    and pre-cast weights to the MXU input dtype.  Run once, reuse per call.

    mxu_dtype=jnp.bfloat16 is recommended on all chips (on v5e especially,
    where f32 matmuls lower to multi-pass); biases stay f32 (added post-MXU).
    """
    w1, b1, wmu, bmu, wsg, bsg = params
    x_dim, h_dim = w1.shape
    z_dim = wmu.shape[1]

    xp = _round_up(x_dim, 128)
    hp = _round_up(h_dim, 128)
    zp2 = _round_up(2 * z_dim, 128)

    wdt = jnp.float32 if mxu_dtype is None else mxu_dtype
    w1p = (jnp.zeros((xp, hp), jnp.float32)
           .at[:x_dim, :h_dim].set(w1).astype(wdt))
    b1p = jnp.zeros((1, hp), jnp.float32).at[:, :h_dim].set(b1.reshape(1, -1))

    wh = jnp.concatenate([wmu, wsg], axis=1)                       # [h, 2z]
    bh = jnp.concatenate([bmu.reshape(1, -1), bsg.reshape(1, -1)], axis=1)
    whp = (jnp.zeros((hp, zp2), jnp.float32)
           .at[:h_dim, :2 * z_dim].set(wh).astype(wdt))
    bhp = jnp.zeros((1, zp2), jnp.float32).at[:, :2 * z_dim].set(bh)

    # TODO(synk): optional fp8 weight quantization for v7x (f32 accumulation)
    # when the quality budget allows; would mirror the bf16 plumbing here.
    return dict(w1p=w1p, b1p=b1p, whp=whp, bhp=bhp,
                x_dim=x_dim, h_dim=h_dim, z_dim=z_dim,
                xp=xp, hp=hp, zp2=zp2, compute_dtype=wdt)


# ---------------------------------------------------------------------------
# Forward wrapper
# ---------------------------------------------------------------------------
_SINGLE_BUFFER_WEIGHTS_OK = None  # resolved on first call, then cached


def _weight_spec(shape, single_buffer):
    idx = lambda i: (0,) * len(shape)
    if single_buffer:
        # Grid-invariant operand: keep ONE VMEM copy instead of the default
        # double buffer (block index never changes across the grid).
        return pl.BlockSpec(shape, idx, pipeline_mode=pl.Buffered(1))
    return pl.BlockSpec(shape, idx)


def encoder_forward(x, prepared, *, block_b=1024,
                    vmem_budget_bytes=32 * 1024 * 1024):
    """x: [B, x_dim] float32; `prepared` from prepare_params (one-time).
    Returns (mu [B, z_dim], sigma_sq [B, z_dim]) in float32."""
    global _SINGLE_BUFFER_WEIGHTS_OK

    p = prepared
    B, x_dim = x.shape
    assert x_dim == p["x_dim"]
    xp, hp, zp2, z_dim = p["xp"], p["hp"], p["zp2"], p["z_dim"]
    compute_dtype = p["compute_dtype"]
    isz = jnp.dtype(compute_dtype).itemsize
    # bf16 packs two rows per sublane -> keep batch tiles 16-row aligned.
    sublane = 16 if isz < 4 else 8

    # ---- Batch tile: as large as the VMEM budget allows (HBM roofline),
    #      but >=2 grid steps when B permits so v7x's 2nd TensorCore is used.
    weight_bytes = (xp * hp + hp * zp2) * isz + (hp + zp2) * 4

    def _tile_bytes(t):
        # double-buffered streamed x / out tiles + f32 h, y intermediates
        return 2 * t * (xp * isz + zp2 * 4) + t * (hp + 2 * zp2) * 4

    tb = min(_round_up(max(pl.cdiv(B, 2), 1), sublane),
             _round_up(block_b, sublane))
    while tb > sublane and weight_bytes + _tile_bytes(tb) > vmem_budget_bytes:
        tb = _round_up(tb // 2, sublane)
    bp = _round_up(B, tb)

    # Explicit scoped-VMEM limit; sized to also cover the double-buffered
    # weight fallback, capped below v7x's 64 MiB physical VMEM.
    needed = 2 * weight_bytes + _tile_bytes(tb)
    vmem_limit = int(min(max(needed + (2 << 20), 16 << 20), 60 << 20))

    # ---- Input: only materialize a padded copy when actually required.
    if B == bp and x_dim == xp:
        xin = x.astype(compute_dtype)
    else:
        xin = (jnp.zeros((bp, xp), compute_dtype)
               .at[:B, :x_dim].set(x.astype(compute_dtype)))

    kernel = functools.partial(encoder_kernel, z_dim=z_dim)

    def _run(single_buffer):
        return pl.pallas_call(
            kernel,
            out_shape=jax.ShapeDtypeStruct((bp, zp2), jnp.float32),
            grid=(bp // tb,),
            in_specs=[
                pl.BlockSpec((tb, xp), lambda i: (i, 0)),   # streamed x tiles
                _weight_spec((xp, hp), single_buffer),      # resident weights
                _weight_spec((1, hp), single_buffer),
                _weight_spec((hp, zp2), single_buffer),
                _weight_spec((1, zp2), single_buffer),
            ],
            out_specs=pl.BlockSpec((tb, zp2), lambda i: (i, 0)),
            compiler_params=pltpu.CompilerParams(
                dimension_semantics=("parallel",),
                vmem_limit_bytes=vmem_limit,
            ),
        )(xin, p["w1p"], p["b1p"], p["whp"], p["bhp"])

    if _SINGLE_BUFFER_WEIGHTS_OK is None:
        try:
            out = jax.block_until_ready(_run(True))
            _SINGLE_BUFFER_WEIGHTS_OK = True
        except Exception:
            # pl.Buffered(1) not accepted by this jax build -> default bufs.
            _SINGLE_BUFFER_WEIGHTS_OK = False
            out = _run(False)
    else:
        out = _run(_SINGLE_BUFFER_WEIGHTS_OK)

    mu = out[:B, :z_dim]
    sigma_sq = out[:B, z_dim:2 * z_dim]
    return mu, sigma_sq


# ---------------------------------------------------------------------------
# Reference + synthetic params
# ---------------------------------------------------------------------------
def init_params(key, x_dim, z_dim, h_dim):
    """Deterministic synthetic params matching nn.Linear shapes.
    PyTorch nn.Linear(in, out) stores weight [out, in]; we keep the transpose
    [in, out] so the kernel computes x @ W directly."""
    k1, k2, k3, k4, k5, k6 = jax.random.split(key, 6)
    s1 = 1.0 / jnp.sqrt(x_dim)
    s2 = 1.0 / jnp.sqrt(h_dim)
    w1 = jax.random.uniform(k1, (x_dim, h_dim), jnp.float32, -s1, s1)
    b1 = jax.random.uniform(k2, (1, h_dim), jnp.float32, -s1, s1)
    wmu = jax.random.uniform(k3, (h_dim, z_dim), jnp.float32, -s2, s2)
    bmu = jax.random.uniform(k4, (1, z_dim), jnp.float32, -s2, s2)
    wsg = jax.random.uniform(k5, (h_dim, z_dim), jnp.float32, -s2, s2)
    bsg = jax.random.uniform(k6, (1, z_dim), jnp.float32, -s2, s2)
    return (w1, b1, wmu, bmu, wsg, bsg)


def encoder_ref(x, params):
    """Pure-JAX reference matching the PyTorch forward exactly."""
    w1, b1, wmu, bmu, wsg, bsg = params
    h = jnp.tanh(x @ w1 + b1)
    mu = h @ wmu + bmu
    sigma_sq = jnp.exp(h @ wsg + bsg)
    return mu, sigma_sq


if __name__ == "__main__":
    # Small shapes consistent with the module's forward.
    B, x_dim, h_dim, z_dim = 8, 32, 32, 16

    key = jax.random.PRNGKey(0)
    kx, kp = jax.random.split(key)
    x = jax.random.normal(kx, (B, x_dim), dtype=jnp.float32)
    params = init_params(kp, x_dim, z_dim, h_dim)

    mu_ref, sigma_ref = encoder_ref(x, params)

    # f32 MXU path (bit-close to the PyTorch reference).
    prep_f32 = prepare_params(params)
    mu, sigma_sq = encoder_forward(x, prep_f32)
    mu = jax.block_until_ready(mu)
    sigma_sq = jax.block_until_ready(sigma_sq)
    assert jnp.allclose(mu, mu_ref, atol=1e-5, rtol=1e-5)
    assert jnp.allclose(sigma_sq, sigma_ref, atol=1e-5, rtol=1e-5)

    # bf16 MXU-input fast path (recommended default on v5e/v6e/v7x);
    # f32 accumulation + f32 tanh/exp, looser tolerance by design.
    prep_bf16 = prepare_params(params, mxu_dtype=jnp.bfloat16)
    mu_bf, sigma_bf = encoder_forward(x, prep_bf16)
    mu_bf = jax.block_until_ready(mu_bf)
    sigma_bf = jax.block_until_ready(sigma_bf)
    assert jnp.allclose(mu_bf, mu_ref, atol=5e-2, rtol=5e-2)
    assert jnp.allclose(sigma_bf, sigma_ref, atol=5e-2, rtol=5e-2)

    print("KERNEL_OK")
</pallas_src>

<mosaic_0001>
module attributes {stable_mosaic.version = 11 : i64} {
  func.func @encoder_kernel(%arg0: i32, %arg1: memref<8x128xf32, #tpu.memory_space<vmem>>, %arg2: memref<128x128xf32, #tpu.memory_space<vmem>>, %arg3: memref<1x128xf32, #tpu.memory_space<vmem>>, %arg4: memref<128x128xf32, #tpu.memory_space<vmem>>, %arg5: memref<1x128xf32, #tpu.memory_space<vmem>>, %arg6: memref<8x128xf32, #tpu.memory_space<vmem>>) attributes {dimension_semantics = [#tpu.dimension_semantics<parallel>], iteration_bounds = array<i64: 1>, scalar_prefetch = 0 : i64, scratch_operands = 0 : i64, tpu.core_type = #tpu.core_type<tc>, window_params = [{transform_indices = @transform_0, window_bounds = array<i64: 8, 128>}, {pipeline_mode = #tpu.pipeline_mode<synchronous>, transform_indices = @transform_1, window_bounds = array<i64: 128, 128>}, {pipeline_mode = #tpu.pipeline_mode<synchronous>, transform_indices = @transform_2, window_bounds = array<i64: 1, 128>}, {pipeline_mode = #tpu.pipeline_mode<synchronous>, transform_indices = @transform_3, window_bounds = array<i64: 128, 128>}, {pipeline_mode = #tpu.pipeline_mode<synchronous>, transform_indices = @transform_4, window_bounds = array<i64: 1, 128>}, {transform_indices = @transform_5, window_bounds = array<i64: 8, 128>}]} {
    %c0 = arith.constant 0 : index
    %c0_0 = arith.constant 0 : index
    %0 = vector.load %arg1[%c0, %c0_0] : memref<8x128xf32, #tpu.memory_space<vmem>>, vector<8x128xf32>
    %c0_1 = arith.constant 0 : index
    %c0_2 = arith.constant 0 : index
    %1 = vector.load %arg2[%c0_1, %c0_2] : memref<128x128xf32, #tpu.memory_space<vmem>>, vector<128x128xf32>
    %cst = arith.constant dense<0.000000e+00> : vector<8x128xf32>
    %2 = tpu.matmul %0, %1, %cst {dimension_numbers = #tpu.dot_dimension_numbers<[1], [0], [0], [1], [0, 0, 1, 1], [], []>} : vector<8x128xf32>, vector<128x128xf32>, vector<8x128xf32> -> vector<8x128xf32>
    %c0_3 = arith.constant 0 : index
    %c0_4 = arith.constant 0 : index
    %3 = vector.load %arg3[%c0_3, %c0_4] : memref<1x128xf32, #tpu.memory_space<vmem>>, vector<1x128xf32>
    %4 = vector.broadcast %3 : vector<1x128xf32> to vector<8x128xf32>
    %5 = arith.addf %2, %4 : vector<8x128xf32>
    %6 = math.tanh %5 : vector<8x128xf32>
    %c0_5 = arith.constant 0 : index
    %c0_6 = arith.constant 0 : index
    %7 = vector.load %arg4[%c0_5, %c0_6] : memref<128x128xf32, #tpu.memory_space<vmem>>, vector<128x128xf32>
    %cst_7 = arith.constant dense<0.000000e+00> : vector<8x128xf32>
    %8 = tpu.matmul %6, %7, %cst_7 {dimension_numbers = #tpu.dot_dimension_numbers<[1], [0], [0], [1], [0, 0, 1, 1], [], []>} : vector<8x128xf32>, vector<128x128xf32>, vector<8x128xf32> -> vector<8x128xf32>
    %c0_8 = arith.constant 0 : index
    %c0_9 = arith.constant 0 : index
    %9 = vector.load %arg5[%c0_8, %c0_9] : memref<1x128xf32, #tpu.memory_space<vmem>>, vector<1x128xf32>
    %10 = vector.broadcast %9 : vector<1x128xf32> to vector<8x128xf32>
    %11 = arith.addf %8, %10 : vector<8x128xf32>
    %12 = tpu.iota {dimensions = array<i32: 1>} : vector<1x128xi32>
    %c16_i32 = arith.constant 16 : i32
    %13 = vector.broadcast %c16_i32 : i32 to vector<1x128xi32>
    %14 = arith.cmpi sge, %12, %13 : vector<1x128xi32>
    %c32_i32 = arith.constant 32 : i32
    %15 = vector.broadcast %c32_i32 : i32 to vector<1x128xi32>
    %16 = arith.cmpi slt, %12, %15 : vector<1x128xi32>
    %17 = arith.andi %14, %16 : vector<1x128xi1>
    %cst_10 = arith.constant 0.000000e+00 : f32
    %18 = vector.shape_cast %17 : vector<1x128xi1> to vector<1x128xi1>
    %19 = vector.broadcast %18 : vector<1x128xi1> to vector<8x128xi1>
    %20 = vector.broadcast %cst_10 : f32 to vector<8x128xf32>
    %21 = arith.select %19, %11, %20 : vector<8x128xi1>, vector<8x128xf32>
    %22 = math.exp %21 : vector<8x128xf32>
    %23 = vector.shape_cast %17 : vector<1x128xi1> to vector<1x128xi1>
    %24 = vector.broadcast %23 : vector<1x128xi1> to vector<8x128xi1>
    %25 = arith.select %24, %22, %11 : vector<8x128xi1>, vector<8x128xf32>
    %c0_11 = arith.constant 0 : index
    %c0_12 = arith.constant 0 : index
    %26 = vector.load %arg6[%c0_11, %c0_12] : memref<8x128xf32, #tpu.memory_space<vmem>>, vector<8x128xf32>
    tpu.vector_store %arg6[%c0_11, %c0_12], %25 {strides = array<i32>} : memref<8x128xf32, #tpu.memory_space<vmem>>, vector<8x128xf32>,
    return
  }
  func.func @transform_0(%arg0: i32) -> (i32, i32) {
    %c0_i32 = arith.constant 0 : i32
    %c0_i32_0 = arith.constant 0 : i32
    return %arg0, %c0_i32 : i32, i32
  }
  func.func @transform_1(%arg0: i32) -> (i32, i32) {
    %c0_i32 = arith.constant 0 : i32
    %c0_i32_0 = arith.constant 0 : i32
    %c0_i32_1 = arith.constant 0 : i32
    return %c0_i32, %c0_i32_0 : i32, i32
  }
  func.func @transform_2(%arg0: i32) -> (i32, i32) {
    %c0_i32 = arith.constant 0 : i32
    %c0_i32_0 = arith.constant 0 : i32
    %c0_i32_1 = arith.constant 0 : i32
    return %c0_i32, %c0_i32_0 : i32, i32
  }
  func.func @transform_3(%arg0: i32) -> (i32, i32) {
    %c0_i32 = arith.constant 0 : i32
    %c0_i32_0 = arith.constant 0 : i32
    %c0_i32_1 = arith.constant 0 : i32
    return %c0_i32, %c0_i32_0 : i32, i32
  }
  func.func @transform_4(%arg0: i32) -> (i32, i32) {
    %c0_i32 = arith.constant 0 : i32
    %c0_i32_0 = arith.constant 0 : i32
    %c0_i32_1 = arith.constant 0 : i32
    return %c0_i32, %c0_i32_0 : i32, i32
  }
  func.func @transform_5(%arg0: i32) -> (i32, i32) {
    %c0_i32 = arith.constant 0 : i32
    %c0_i32_0 = arith.constant 0 : i32
    return %arg0, %c0_i32 : i32, i32
  }
}

module attributes {stable_mosaic.version = 11 : i64} {
  func.func @encoder_kernel(%arg0: i32, %arg1: memref<8x128xf32, #tpu.memory_space<vmem>>, %arg2: memref<128x128xf32, #tpu.memory_space<vmem>>, %arg3: memref<1x128xf32, #tpu.memory_space<vmem>>, %arg4: memref<128x128xf32, #tpu.memory_space<vmem>>, %arg5: memref<1x128xf32, #tpu.memory_space<vmem>>, %arg6: memref<8x128xf32, #tpu.memory_space<vmem>>) attributes {dimension_semantics = [#tpu.dimension_semantics<parallel>], iteration_bounds = array<i64: 1>, scalar_prefetch = 0 : i64, scratch_operands = 0 : i64, tpu.core_type = #tpu.core_type<tc>, window_params = [{transform_indices = @transform_0, window_bounds = array<i64: 8, 128>}, {pipeline_mode = #tpu.pipeline_mode<synchronous>, transform_indices = @transform_1, window_bounds = array<i64: 128, 128>}, {pipeline_mode = #tpu.pipeline_mode<synchronous>, transform_indices = @transform_2, window_bounds = array<i64: 1, 128>}, {pipeline_mode = #tpu.pipeline_mode<synchronous>, transform_indices = @transform_3, window_bounds = array<i64: 128, 128>}, {pipeline_mode = #tpu.pipeline_mode<synchronous>, transform_indices = @transform_4, window_bounds = array<i64: 1, 128>}, {transform_indices = @transform_5, window_bounds = array<i64: 8, 128>}]} {
    %c0 = arith.constant 0 : index
    %c0_0 = arith.constant 0 : index
    %0 = vector.load %arg1[%c0, %c0_0] : memref<8x128xf32, #tpu.memory_space<vmem>>, vector<8x128xf32>
    %c0_1 = arith.constant 0 : index
    %c0_2 = arith.constant 0 : index
    %1 = vector.load %arg2[%c0_1, %c0_2] : memref<128x128xf32, #tpu.memory_space<vmem>>, vector<128x128xf32>
    %cst = arith.constant dense<0.000000e+00> : vector<8x128xf32>
    %2 = tpu.matmul %0, %1, %cst {dimension_numbers = #tpu.dot_dimension_numbers<[1], [0], [0], [1], [0, 0, 1, 1], [], []>} : vector<8x128xf32>, vector<128x128xf32>, vector<8x128xf32> -> vector<8x128xf32>
    %c0_3 = arith.constant 0 : index
    %c0_4 = arith.constant 0 : index
    %3 = vector.load %arg3[%c0_3, %c0_4] : memref<1x128xf32, #tpu.memory_space<vmem>>, vector<1x128xf32>
    %4 = vector.broadcast %3 : vector<1x128xf32> to vector<8x128xf32>
    %5 = arith.addf %2, %4 : vector<8x128xf32>
    %6 = math.tanh %5 : vector<8x128xf32>
    %c0_5 = arith.constant 0 : index
    %c0_6 = arith.constant 0 : index
    %7 = vector.load %arg4[%c0_5, %c0_6] : memref<128x128xf32, #tpu.memory_space<vmem>>, vector<128x128xf32>
    %cst_7 = arith.constant dense<0.000000e+00> : vector<8x128xf32>
    %8 = tpu.matmul %6, %7, %cst_7 {dimension_numbers = #tpu.dot_dimension_numbers<[1], [0], [0], [1], [0, 0, 1, 1], [], []>} : vector<8x128xf32>, vector<128x128xf32>, vector<8x128xf32> -> vector<8x128xf32>
    %c0_8 = arith.constant 0 : index
    %c0_9 = arith.constant 0 : index
    %9 = vector.load %arg5[%c0_8, %c0_9] : memref<1x128xf32, #tpu.memory_space<vmem>>, vector<1x128xf32>
    %10 = vector.broadcast %9 : vector<1x128xf32> to vector<8x128xf32>
    %11 = arith.addf %8, %10 : vector<8x128xf32>
    %12 = tpu.iota {dimensions = array<i32: 1>} : vector<1x128xi32>
    %c16_i32 = arith.constant 16 : i32
    %13 = vector.broadcast %c16_i32 : i32 to vector<1x128xi32>
    %14 = arith.cmpi sge, %12, %13 : vector<1x128xi32>
    %c32_i32 = arith.constant 32 : i32
    %15 = vector.broadcast %c32_i32 : i32 to vector<1x128xi32>
    %16 = arith.cmpi slt, %12, %15 : vector<1x128xi32>
    %17 = arith.andi %14, %16 : vector<1x128xi1>
    %cst_10 = arith.constant 0.000000e+00 : f32
    %18 = vector.shape_cast %17 : vector<1x128xi1> to vector<1x128xi1>
    %19 = vector.broadcast %18 : vector<1x128xi1> to vector<8x128xi1>
    %20 = vector.broadcast %cst_10 : f32 to vector<8x128xf32>
    %21 = arith.select %19, %11, %20 : vector<8x128xi1>, vector<8x128xf32>
    %22 = math.exp %21 : vector<8x128xf32>
    %23 = vector.shape_cast %17 : vector<1x128xi1> to vector<1x128xi1>
    %24 = vector.broadcast %23 : vector<1x128xi1> to vector<8x128xi1>
    %25 = arith.select %24, %22, %11 : vector<8x128xi1>, vector<8x128xf32>
    %c0_11 = arith.constant 0 : index
    %c0_12 = arith.constant 0 : index
    %26 = vector.load %arg6[%c0_11, %c0_12] : memref<8x128xf32, #tpu.memory_space<vmem>>, vector<8x128xf32>
    tpu.vector_store %arg6[%c0_11, %c0_12], %25 {strides = array<i32>} : memref<8x128xf32, #tpu.memory_space<vmem>>, vector<8x128xf32>,
    return
  }
  func.func @transform_0(%arg0: i32) -> (i32, i32) {
    %c0_i32 = arith.constant 0 : i32
    %c0_i32_0 = arith.constant 0 : i32
    return %arg0, %c0_i32 : i32, i32
  }
  func.func @transform_1(%arg0: i32) -> (i32, i32) {
    %c0_i32 = arith.constant 0 : i32
    %c0_i32_0 = arith.constant 0 : i32
    %c0_i32_1 = arith.constant 0 : i32
    return %c0_i32, %c0_i32_0 : i32, i32
  }
  func.func @transform_2(%arg0: i32) -> (i32, i32) {
    %c0_i32 = arith.constant 0 : i32
    %c0_i32_0 = arith.constant 0 : i32
    %c0_i32_1 = arith.constant 0 : i32
    return %c0_i32, %c0_i32_0 : i32, i32
  }
  func.func @transform_3(%arg0: i32) -> (i32, i32) {
    %c0_i32 = arith.constant 0 : i32
    %c0_i32_0 = arith.constant 0 : i32
    %c0_i32_1 = arith.constant 0 : i32
    return %c0_i32, %c0_i32_0 : i32, i32
  }
  func.func @transform_4(%arg0: i32) -> (i32, i32) {
    %c0_i32 = arith.constant 0 : i32
    %c0_i32_0 = arith.constant 0 : i32
    %c0_i32_1 = arith.constant 0 : i32
    return %c0_i32, %c0_i32_0 : i32, i32
  }
  func.func @transform_5(%arg0: i32) -> (i32, i32) {
    %c0_i32 = arith.constant 0 : i32
    %c0_i32_0 = arith.constant 0 : i32
    return %arg0, %c0_i32 : i32, i32
  }
}

</mosaic_0001>

<bundles_post_ra>
// kernel: tpu_custom_call.1
= control target key start
LH: loop header
LB: loop body
LE: loop exit
PB: predicated region body
PF: predicated region fallthrough
CT: control target
= control target key end

     0   :  { %10 = vsyncpa [#allocation3], 0  ;;  %s652_s0 = inlined_call_operand.hbm [shape: f32[8,128], index: 0, kind: input, shape index: {}]   ;;  %s653_s1 = inlined_call_operand.hbm [shape: f32[128,128], index: 1, kind: input, shape index: {}]   ;;  %s654_s2 = inlined_call_operand.vmem [shape: f32[1,128], index: 2, kind: input, shape index: {}]   ;;  %s655_s3 = inlined_call_operand.hbm [shape: f32[128,128], index: 3, kind: input, shape index: {}]   ;;  %s656_s4 = inlined_call_operand.vmem [shape: f32[1,128], index: 4, kind: input, shape index: {}]   ;;  %s657_s5 = inlined_call_operand.hbm [shape: f32[8,128], index: 5, kind: output, shape index: {}]  }
   0x1   :  { %11 = vsyncpa [#allocation6], 0 }
   0x2   :  { %12 = vsyncpa [#allocation4], 0  ;;  %s537_s18 = smov [#allocation5]   ;;  %s443_s22 = scalar_lea.hbm %s653_s1, 2048 }
   0x3   :  { %s28_s19 = sshll.u32 %s537_s18, 4  ;;  %p444_p0 = scmp.ne.s32.totalorder %s653_s1, %s443_s22  ;;  %s29_s19 = int_to_ptr.vmem [resolvable:$true] %s28_s19 }
   0x4   :  { %p447_p1 = scmp.lt.u32.totalorder %s443_s22, %s653_s1 }
   0x6   :  { %p449_p2 = pnand %p447_p1, %p444_p0 }
   0x8   :  { %452 = shalt.err (!%p449_p2)
}
   0x9   :  { %s453_s27 = scalar_lea.vmem %s29_s19, 2048  ;;  %p458_p4 = scmp.lt.s32.totalorder %s29_s19, %s29_s19 }
   0xa   :  { %p454_p3 = scmp.ne.s32.totalorder %s29_s19, %s453_s27  ;;  %p459_p5 = scmp.lt.s32.totalorder %s453_s27, %s453_s27 }
   0xc   :  { %p460_p6 = por %p459_p5, %p458_p4 }
   0xe   :  { %p461_p7 = pnand %p460_p6, %p454_p3 }
  0x10   :  { %464 = shalt.err (!%p461_p7)
}
  0x11   :  { %s538_s28 = smov 128   ;;  %s539_s29 = smov 8  }
  0x12   :  { %34 = dma.hbm_to_vmem [thread:$0]  %s653_s1, 2048, %s29_s19, [#allocation6], %s538_s28, %s538_s28, %s539_s29  }
  0x13   :  { %s540_s7 = smov [#allocation2]   ;;  %s541_s9 = smov [#allocation7]  }
  0x14   :  { %s19_s8 = sshll.u32 %s540_s7, 4  ;;  %s42_s10 = sshll.u32 %s541_s9, 4  ;;  %s20_s8 = int_to_ptr.vmem [resolvable:$true] %s19_s8  ;;  %s43_s10 = int_to_ptr.vmem [resolvable:$true] %s42_s10 }
  0x15   :  { %s465_s13 = scalar_lea.hbm %s652_s0, 128 }
  0x16   :  { %p466_p8 = scmp.ne.s32.totalorder %s652_s0, %s465_s13  ;;  %p469_p9 = scmp.lt.u32.totalorder %s465_s13, %s652_s0 }
  0x18   :  { %p471_p10 = pnand %p469_p9, %p466_p8 }
  0x1a   :  { %474 = shalt.err (!%p471_p10)
}
  0x1b   :  { %s475_s1 = scalar_lea.vmem %s20_s8, 128  ;;  %p480_p12 = scmp.lt.s32.totalorder %s20_s8, %s20_s8 }
  0x1c   :  { %p476_p11 = scmp.ne.s32.totalorder %s20_s8, %s475_s1  ;;  %p481_p13 = scmp.lt.s32.totalorder %s475_s1, %s475_s1 }
  0x1e   :  { %p482_p0 = por %p481_p13, %p480_p12 }
  0x20   :  { %p483_p1 = pnand %p482_p0, %p476_p11 }
  0x22   :  { %486 = shalt.err (!%p483_p1)
}
  0x23   :  { %22 = dma.hbm_to_vmem [thread:$0]  %s652_s0, 128, %s20_s8, [#allocation3]  }
  0x24   :  { %s487_s22 = scalar_lea.hbm %s655_s3, 2048 }
  0x25   :  { %p488_p2 = scmp.ne.s32.totalorder %s655_s3, %s487_s22  ;;  %p491_p3 = scmp.lt.u32.totalorder %s487_s22, %s655_s3 }
  0x27   :  { %p493_p4 = pnand %p491_p3, %p488_p2 }
  0x29   :  { %496 = shalt.err (!%p493_p4)
}
  0x2a   :  { %s497_s27 = scalar_lea.vmem %s43_s10, 2048  ;;  %p502_p6 = scmp.lt.s32.totalorder %s43_s10, %s43_s10 }
  0x2b   :  { %p498_p5 = scmp.ne.s32.totalorder %s43_s10, %s497_s27  ;;  %p503_p7 = scmp.lt.s32.totalorder %s497_s27, %s497_s27 }
  0x2d   :  { %p504_p8 = por %p503_p7, %p502_p6 }
  0x2f   :  { %p505_p9 = pnand %p504_p8, %p498_p5 }
  0x31   :  { %508 = shalt.err (!%p505_p9)
}
  0x32   :  { %48 = dma.hbm_to_vmem [thread:$0]  %s655_s3, 2048, %s43_s10, [#allocation6], %s538_s28, %s538_s28, %s539_s29  }
  0x33   :  { %531 = dma.done.wait [#allocation3], 128  }
  0x34   :  { %532 = vsyncadd [#allocation3], 4294967168 }
  0x35   :  { %533 = dma.done.wait [#allocation6], 4096  }
  0x36   :  { %534 = vsyncadd [#allocation6], 4294963200  ;;  %v542_v0 = vmov 0.0|0.0   ;;  %vm543_vm0 = vmmov 0   ;;  %v544_v1 = vmov 0.0   ;;  %v61_v2 = vld [vmem:[#allocation5] sm:$0xff]  ;;  %v248_v56 = vlaneseq }
  0x37   :  { %382 = vmatprep.subr.bf16.mxu0 %v542_v0  ;;  %344 = vmatprep.mubr.msk.f32.mxu0 %vm543_vm0, %v544_v1  ;;  %v62_v3 = vld [vmem:[#allocation5 + $0x8] sm:$0xff]  ;;  %v63_v4 = vld [vmem:[#allocation5 + $0x10] sm:$0xff]  ;;  %v64_v6 = vld [vmem:[#allocation5 + $0x18] sm:$0xff] }
  0x38   :  { %406 = vmatprep.subr.bf16.mxu1 %v542_v0  ;;  %379 = vmatprep.mubr.msk.f32.mxu1 %vm543_vm0, %v544_v1  ;;  %v383_v5 = vpack.c.bf16 %v62_v3, %v61_v2  ;;  %v386_v7 = vpack.c.bf16 %v64_v6, %v63_v4  ;;  %v65_v8 = vld [vmem:[#allocation5 + $0x20] sm:$0xff]  ;;  %v66_v9 = vld [vmem:[#allocation5 + $0x28] sm:$0xff]  ;;  %v157_v12 = vld [vmem:[#allocation7 + $0x10] sm:$0xff]  ;;  %v249_v57 = vand.u32 127, %v248_v56 }
  0x39   :  { %v155_v10 = vld [vmem:[#allocation7] sm:$0xff]  ;;  %v156_v11 = vld [vmem:[#allocation7 + $0x8] sm:$0xff]  ;;  %v158_v13 = vld [vmem:[#allocation7 + $0x18] sm:$0xff]  ;;  %v389_v14 = vpack.c.bf16 %v66_v9, %v65_v8 }
  0x3a   :  { %384 = vmatpush3.bf16.msra.mxu0 %v383_v5  ;;  %v407_v15 = vpack.c.bf16 %v156_v11, %v155_v10  ;;  %v67_v16 = vld [vmem:[#allocation5 + $0x30] sm:$0xff]  ;;  %v68_v17 = vld [vmem:[#allocation5 + $0x38] sm:$0xff]  ;;  %v410_v18 = vpack.c.bf16 %v158_v13, %v157_v12  ;;  %v159_v19 = vld [vmem:[#allocation7 + $0x20] sm:$0xff]  ;;  %vm250_vm1 = vcmp.ge.s32.totalorder %v249_v57, 16  ;;  %vm251_vm2 = vcmp.lt.s32.totalorder %v249_v57, 32 }
  0x3b   :  { %385 = vmatprep.subr.bf16.mxu0 %v542_v0  ;;  %v160_v20 = vld [vmem:[#allocation7 + $0x28] sm:$0xff]  ;;  %v392_v21 = vpack.c.bf16 %v68_v17, %v67_v16  ;;  %v69_v22 = vld [vmem:[#allocation5 + $0x40] sm:$0xff]  ;;  %v161_v25 = vld [vmem:[#allocation7 + $0x30] sm:$0xff] }
  0x3c   :  { %408 = vmatpush3.bf16.msra.mxu1 %v407_v15  ;;  %v70_v23 = vld [vmem:[#allocation5 + $0x48] sm:$0xff]  ;;  %v413_v24 = vpack.c.bf16 %v160_v20, %v159_v19  ;;  %v162_v26 = vld [vmem:[#allocation7 + $0x38] sm:$0xff]  ;;  %v71_v28 = vld [vmem:[#allocation5 + $0x50] sm:$0xff] }
  0x3d   :  { %409 = vmatprep.subr.bf16.mxu1 %v542_v0  ;;  %v395_v27 = vpack.c.bf16 %v70_v23, %v69_v22  ;;  %v72_v29 = vld [vmem:[#allocation5 + $0x58] sm:$0xff]  ;;  %v416_v30 = vpack.c.bf16 %v162_v26, %v161_v25  ;;  %v163_v31 = vld [vmem:[#allocation7 + $0x40] sm:$0xff]  ;;  %v164_v32 = vld [vmem:[#allocation7 + $0x48] sm:$0xff] }
  0x3e   :  { %387 = vmatpush3.bf16.msra.mxu0 %v386_v7  ;;  %v398_v33 = vpack.c.bf16 %v72_v29, %v71_v28  ;;  %v73_v34 = vld [vmem:[#allocation5 + $0x60] sm:$0xff]  ;;  %v74_v35 = vld [vmem:[#allocation5 + $0x68] sm:$0xff]  ;;  %v419_v36 = vpack.c.bf16 %v164_v32, %v163_v31  ;;  %v75_v38 = vld [vmem:[#allocation5 + $0x70] sm:$0xff] }
  0x3f   :  { %388 = vmatprep.subr.bf16.mxu0 %v542_v0  ;;  %v401_v37 = vpack.c.bf16 %v74_v35, %v73_v34  ;;  %v76_v39 = vld [vmem:[#allocation5 + $0x78] sm:$0xff]  ;;  %v165_v42 = vld [vmem:[#allocation7 + $0x50] sm:$0xff]  ;;  %v167_v45 = vld [vmem:[#allocation7 + $0x60] sm:$0xff] }
  0x40   :  { %411 = vmatpush3.bf16.msra.mxu1 %v410_v18  ;;  %v404_v40 = vpack.c.bf16 %v76_v39, %v75_v38  ;;  %v60_v41 = vld [vmem:[#allocation2] sm:$0xff]  ;;  %v168_v46 = vld [vmem:[#allocation7 + $0x68] sm:$0xff]  ;;  %v169_v48 = vld [vmem:[#allocation7 + $0x70] sm:$0xff] }
  0x41   :  { %412 = vmatprep.subr.bf16.mxu1 %v542_v0  ;;  %v166_v43 = vld [vmem:[#allocation7 + $0x58] sm:$0xff]  ;;  %v425_v47 = vpack.c.bf16 %v168_v46, %v167_v45  ;;  %vm252_vm3 = vmand %vm250_vm1, %vm251_vm2 }
  0x42   :  { %390 = vmatpush3.bf16.msra.mxu0 %v389_v14  ;;  %v422_v44 = vpack.c.bf16 %v166_v43, %v165_v42  ;;  %v170_v49 = vld [vmem:[#allocation7 + $0x78] sm:$0xff] }
  0x43   :  { %391 = vmatprep.subr.bf16.mxu0 %v542_v0  ;;  %v428_v50 = vpack.c.bf16 %v170_v49, %v169_v48  ;;  %v276_v51 = vld [vmem:[%s654_s2] ss:$0 sm:$0xff]  ;;  %s545_s2 = smov [#allocation8]  }
  0x44   :  { %414 = vmatpush3.bf16.msra.mxu1 %v413_v24  ;;  %v277_v58 = vld [vmem:[%s656_s4] ss:$0 sm:$0xff]  ;;  %s266_s7 = sshll.u32 %s545_s2, 4  ;;  %s267_s7 = int_to_ptr.vmem [resolvable:$true] %s266_s7 }
  0x45   :  { %415 = vmatprep.subr.bf16.mxu1 %v542_v0  ;;  %s509_s8 = scalar_lea.vmem %s267_s7, 128  ;;  %p514_p11 = scmp.lt.s32.totalorder %s267_s7, %s267_s7 }
  0x46   :  { %393 = vmatpush3.bf16.msra.mxu0 %v392_v21  ;;  %p510_p10 = scmp.ne.s32.totalorder %s267_s7, %s509_s8  ;;  %p515_p12 = scmp.lt.s32.totalorder %s509_s8, %s509_s8 }
  0x47   :  { %394 = vmatprep.subr.bf16.mxu0 %v542_v0 }
  0x48   :  { %417 = vmatpush3.bf16.msra.mxu1 %v416_v30  ;;  %p516_p13 = por %p515_p12, %p514_p11 }
  0x49   :  { %418 = vmatprep.subr.bf16.mxu1 %v542_v0 }
  0x4a   :  { %396 = vmatpush3.bf16.msra.mxu0 %v395_v27  ;;  %p517_p0 = pnand %p516_p13, %p510_p10 }
  0x4b   :  { %397 = vmatprep.subr.bf16.mxu0 %v542_v0 }
  0x4c   :  { %420 = vmatpush3.bf16.msra.mxu1 %v419_v36 }
  0x4d   :  { %421 = vmatprep.subr.bf16.mxu1 %v542_v0 }
  0x4e   :  { %399 = vmatpush3.bf16.msra.mxu0 %v398_v33 }
  0x4f   :  { %400 = vmatprep.subr.bf16.mxu0 %v542_v0 }
  0x50   :  { %423 = vmatpush3.bf16.msra.mxu1 %v422_v44 }
  0x51   :  { %424 = vmatprep.subr.bf16.mxu1 %v542_v0 }
  0x52   :  { %402 = vmatpush3.bf16.msra.mxu0 %v401_v37 }
  0x53   :  { %403 = vmatprep.subr.bf16.mxu0 %v542_v0 }
  0x54   :  { %426 = vmatpush3.bf16.msra.mxu1 %v425_v47 }
  0x55   :  { %427 = vmatprep.subr.bf16.mxu1 %v542_v0 }
  0x56   :  { %405 = vmatpush3.bf16.msra.mxu0 %v404_v40 }
  0x58   :  { %429 = vmatpush3.bf16.msra.mxu1 %v428_v50 }
  0x59   :  { %345 = vmatmul.mubr.f32.vlgmr.msra.gmra.mrb[0].mxu0 %v60_v41 }
 0x12c   :  { %v150_v52 = vpop.f32.mrb[0].mxu0 }
 0x12d   :  { %v151_v53 = vadd.f32 %v276_v51, %v150_v52  ;;  %v346_v54 = vpop.f32.mrb[1].mxu0 }
 0x12f   :  { %439 = vtanh.f32 %v151_v53 }
 0x139   :  { %v440_v55 = vpop.eup %439 }
 0x13a   :  { %380 = vmatmul.mubr.f32.vlgmr.msra.gmra.mrb[0].mxu1 %v440_v55 }
 0x20d   :  { %v244_v59 = vpop.f32.mrb[0].mxu1 }
 0x20e   :  { %v245_v60 = vadd.f32 %v277_v58, %v244_v59  ;;  %v381_v61 = vpop.f32.mrb[1].mxu1 }
 0x210   :  { %v255_v62 = vsel %vm252_vm3, %v245_v60, 0.0 }
 0x211   :  { %v256_v63 = vmul.f32 1.442695, %v255_v62 }
 0x213   :  { %441 = vpow2.f32 %v256_v63 }
 0x21d   :  { %v442_v0 = vpop.eup %441 }
 0x21e   :  { %v258_v1 = vsel %vm252_vm3, %v442_v0, %v245_v60 }
 0x21f   :  { %259 = vst [vmem:[#allocation8] sm:$0xff] %v258_v1 }
 0x220   :  { %520 = shalt.err (!%p517_p0)
}
 0x221   :  { %s521_s10 = scalar_lea.hbm %s657_s5, 128 }
 0x222   :  { %p522_p1 = scmp.ne.s32.totalorder %s657_s5, %s521_s10  ;;  %p525_p2 = scmp.lt.u32.totalorder %s521_s10, %s657_s5 }
 0x224   :  { %p527_p3 = pnand %p525_p2, %p522_p1 }
 0x226   :  { %530 = shalt.err (!%p527_p3)
}
 0x227   :  { %269 = dma.vmem_to_hbm [thread:$0]  %s267_s7, 128, %s657_s5, [#allocation4]  }
 0x228   :  { %535 = dma.done.wait [#allocation4], 128  }
 0x229   :  { %536 = vsyncadd [#allocation4], 4294967168 }
 0x22a   :  { %273 = vsyncpa [#allocation3], 1 }
 0x22b   :  { %274 = vsyncpa [#allocation6], 1 }
 0x22c   :  { %275 = vsyncpa [#allocation4], 1 }

// kernel: tpu_custom_call.1
= control target key start
LH: loop header
LB: loop body
LE: loop exit
PB: predicated region body
PF: predicated region fallthrough
CT: control target
= control target key end

     0   :  { %10 = vsyncpa [#allocation3], 0  ;;  %s652_s0 = inlined_call_operand.hbm [shape: f32[8,128], index: 0, kind: input, shape index: {}]   ;;  %s653_s1 = inlined_call_operand.hbm [shape: f32[128,128], index: 1, kind: input, shape index: {}]   ;;  %s654_s2 = inlined_call_operand.vmem [shape: f32[1,128], index: 2, kind: input, shape index: {}]   ;;  %s655_s3 = inlined_call_operand.hbm [shape: f32[128,128], index: 3, kind: input, shape index: {}]   ;;  %s656_s4 = inlined_call_operand.vmem [shape: f32[1,128], index: 4, kind: input, shape index: {}]   ;;  %s657_s5 = inlined_call_operand.hbm [shape: f32[8,128], index: 5, kind: output, shape index: {}]  }
   0x1   :  { %11 = vsyncpa [#allocation6], 0 }
   0x2   :  { %12 = vsyncpa [#allocation4], 0  ;;  %s537_s18 = smov [#allocation5]   ;;  %s443_s22 = scalar_lea.hbm %s653_s1, 2048 }
   0x3   :  { %s28_s19 = sshll.u32 %s537_s18, 4  ;;  %p444_p0 = scmp.ne.s32.totalorder %s653_s1, %s443_s22  ;;  %s29_s19 = int_to_ptr.vmem [resolvable:$true] %s28_s19 }
   0x4   :  { %p447_p1 = scmp.lt.u32.totalorder %s443_s22, %s653_s1 }
   0x6   :  { %p449_p2 = pnand %p447_p1, %p444_p0 }
   0x8   :  { %452 = shalt.err (!%p449_p2)
}
   0x9   :  { %s453_s27 = scalar_lea.vmem %s29_s19, 2048  ;;  %p458_p4 = scmp.lt.s32.totalorder %s29_s19, %s29_s19 }
   0xa   :  { %p454_p3 = scmp.ne.s32.totalorder %s29_s19, %s453_s27  ;;  %p459_p5 = scmp.lt.s32.totalorder %s453_s27, %s453_s27 }
   0xc   :  { %p460_p6 = por %p459_p5, %p458_p4 }
   0xe   :  { %p461_p7 = pnand %p460_p6, %p454_p3 }
  0x10   :  { %464 = shalt.err (!%p461_p7)
}
  0x11   :  { %s538_s28 = smov 128   ;;  %s539_s29 = smov 8  }
  0x12   :  { %34 = dma.hbm_to_vmem [thread:$0]  %s653_s1, 2048, %s29_s19, [#allocation6], %s538_s28, %s538_s28, %s539_s29  }
  0x13   :  { %s540_s7 = smov [#allocation2]   ;;  %s541_s9 = smov [#allocation7]  }
  0x14   :  { %s19_s8 = sshll.u32 %s540_s7, 4  ;;  %s42_s10 = sshll.u32 %s541_s9, 4  ;;  %s20_s8 = int_to_ptr.vmem [resolvable:$true] %s19_s8  ;;  %s43_s10 = int_to_ptr.vmem [resolvable:$true] %s42_s10 }
  0x15   :  { %s465_s13 = scalar_lea.hbm %s652_s0, 128 }
  0x16   :  { %p466_p8 = scmp.ne.s32.totalorder %s652_s0, %s465_s13  ;;  %p469_p9 = scmp.lt.u32.totalorder %s465_s13, %s652_s0 }
  0x18   :  { %p471_p10 = pnand %p469_p9, %p466_p8 }
  0x1a   :  { %474 = shalt.err (!%p471_p10)
}
  0x1b   :  { %s475_s1 = scalar_lea.vmem %s20_s8, 128  ;;  %p480_p12 = scmp.lt.s32.totalorder %s20_s8, %s20_s8 }
  0x1c   :  { %p476_p11 = scmp.ne.s32.totalorder %s20_s8, %s475_s1  ;;  %p481_p13 = scmp.lt.s32.totalorder %s475_s1, %s475_s1 }
  0x1e   :  { %p482_p0 = por %p481_p13, %p480_p12 }
  0x20   :  { %p483_p1 = pnand %p482_p0, %p476_p11 }
  0x22   :  { %486 = shalt.err (!%p483_p1)
}
  0x23   :  { %22 = dma.hbm_to_vmem [thread:$0]  %s652_s0, 128, %s20_s8, [#allocation3]  }
  0x24   :  { %s487_s22 = scalar_lea.hbm %s655_s3, 2048 }
  0x25   :  { %p488_p2 = scmp.ne.s32.totalorder %s655_s3, %s487_s22  ;;  %p491_p3 = scmp.lt.u32.totalorder %s487_s22, %s655_s3 }
  0x27   :  { %p493_p4 = pnand %p491_p3, %p488_p2 }
  0x29   :  { %496 = shalt.err (!%p493_p4)
}
  0x2a   :  { %s497_s27 = scalar_lea.vmem %s43_s10, 2048  ;;  %p502_p6 = scmp.lt.s32.totalorder %s43_s10, %s43_s10 }
  0x2b   :  { %p498_p5 = scmp.ne.s32.totalorder %s43_s10, %s497_s27  ;;  %p503_p7 = scmp.lt.s32.totalorder %s497_s27, %s497_s27 }
  0x2d   :  { %p504_p8 = por %p503_p7, %p502_p6 }
  0x2f   :  { %p505_p9 = pnand %p504_p8, %p498_p5 }
  0x31   :  { %508 = shalt.err (!%p505_p9)
}
  0x32   :  { %48 = dma.hbm_to_vmem [thread:$0]  %s655_s3, 2048, %s43_s10, [#allocation6], %s538_s28, %s538_s28, %s539_s29  }
  0x33   :  { %531 = dma.done.wait [#allocation3], 128  }
  0x34   :  { %532 = vsyncadd [#allocation3], 4294967168 }
  0x35   :  { %533 = dma.done.wait [#allocation6], 4096  }
  0x36   :  { %534 = vsyncadd [#allocation6], 4294963200  ;;  %v542_v0 = vmov 0.0|0.0   ;;  %vm543_vm0 = vmmov 0   ;;  %v544_v1 = vmov 0.0   ;;  %v61_v2 = vld [vmem:[#allocation5] sm:$0xff]  ;;  %v248_v56 = vlaneseq }
  0x37   :  { %382 = vmatprep.subr.bf16.mxu0 %v542_v0  ;;  %344 = vmatprep.mubr.msk.f32.mxu0 %vm543_vm0, %v544_v1  ;;  %v62_v3 = vld [vmem:[#allocation5 + $0x8] sm:$0xff]  ;;  %v63_v4 = vld [vmem:[#allocation5 + $0x10] sm:$0xff]  ;;  %v64_v6 = vld [vmem:[#allocation5 + $0x18] sm:$0xff] }
  0x38   :  { %406 = vmatprep.subr.bf16.mxu1 %v542_v0  ;;  %379 = vmatprep.mubr.msk.f32.mxu1 %vm543_vm0, %v544_v1  ;;  %v383_v5 = vpack.c.bf16 %v62_v3, %v61_v2  ;;  %v386_v7 = vpack.c.bf16 %v64_v6, %v63_v4  ;;  %v65_v8 = vld [vmem:[#allocation5 + $0x20] sm:$0xff]  ;;  %v66_v9 = vld [vmem:[#allocation5 + $0x28] sm:$0xff]  ;;  %v157_v12 = vld [vmem:[#allocation7 + $0x10] sm:$0xff]  ;;  %v249_v57 = vand.u32 127, %v248_v56 }
  0x39   :  { %v155_v10 = vld [vmem:[#allocation7] sm:$0xff]  ;;  %v156_v11 = vld [vmem:[#allocation7 + $0x8] sm:$0xff]  ;;  %v158_v13 = vld [vmem:[#allocation7 + $0x18] sm:$0xff]  ;;  %v389_v14 = vpack.c.bf16 %v66_v9, %v65_v8 }
  0x3a   :  { %384 = vmatpush3.bf16.msra.mxu0 %v383_v5  ;;  %v407_v15 = vpack.c.bf16 %v156_v11, %v155_v10  ;;  %v67_v16 = vld [vmem:[#allocation5 + $0x30] sm:$0xff]  ;;  %v68_v17 = vld [vmem:[#allocation5 + $0x38] sm:$0xff]  ;;  %v410_v18 = vpack.c.bf16 %v158_v13, %v157_v12  ;;  %v159_v19 = vld [vmem:[#allocation7 + $0x20] sm:$0xff]  ;;  %vm250_vm1 = vcmp.ge.s32.totalorder %v249_v57, 16  ;;  %vm251_vm2 = vcmp.lt.s32.totalorder %v249_v57, 32 }
  0x3b   :  { %385 = vmatprep.subr.bf16.mxu0 %v542_v0  ;;  %v160_v20 = vld [vmem:[#allocation7 + $0x28] sm:$0xff]  ;;  %v392_v21 = vpack.c.bf16 %v68_v17, %v67_v16  ;;  %v69_v22 = vld [vmem:[#allocation5 + $0x40] sm:$0xff]  ;;  %v161_v25 = vld [vmem:[#allocation7 + $0x30] sm:$0xff] }
  0x3c   :  { %408 = vmatpush3.bf16.msra.mxu1 %v407_v15  ;;  %v70_v23 = vld [vmem:[#allocation5 + $0x48] sm:$0xff]  ;;  %v413_v24 = vpack.c.bf16 %v160_v20, %v159_v19  ;;  %v162_v26 = vld [vmem:[#allocation7 + $0x38] sm:$0xff]  ;;  %v71_v28 = vld [vmem:[#allocation5 + $0x50] sm:$0xff] }
  0x3d   :  { %409 = vmatprep.subr.bf16.mxu1 %v542_v0  ;;  %v395_v27 = vpack.c.bf16 %v70_v23, %v69_v22  ;;  %v72_v29 = vld [vmem:[#allocation5 + $0x58] sm:$0xff]  ;;  %v416_v30 = vpack.c.bf16 %v162_v26, %v161_v25  ;;  %v163_v31 = vld [vmem:[#allocation7 + $0x40] sm:$0xff]  ;;  %v164_v32 = vld [vmem:[#allocation7 + $0x48] sm:$0xff] }
  0x3e   :  { %387 = vmatpush3.bf16.msra.mxu0 %v386_v7  ;;  %v398_v33 = vpack.c.bf16 %v72_v29, %v71_v28  ;;  %v73_v34 = vld [vmem:[#allocation5 + $0x60] sm:$0xff]  ;;  %v74_v35 = vld [vmem:[#allocation5 + $0x68] sm:$0xff]  ;;  %v419_v36 = vpack.c.bf16 %v164_v32, %v163_v31  ;;  %v75_v38 = vld [vmem:[#allocation5 + $0x70] sm:$0xff] }
  0x3f   :  { %388 = vmatprep.subr.bf16.mxu0 %v542_v0  ;;  %v401_v37 = vpack.c.bf16 %v74_v35, %v73_v34  ;;  %v76_v39 = vld [vmem:[#allocation5 + $0x78] sm:$0xff]  ;;  %v165_v42 = vld [vmem:[#allocation7 + $0x50] sm:$0xff]  ;;  %v167_v45 = vld [vmem:[#allocation7 + $0x60] sm:$0xff] }
  0x40   :  { %411 = vmatpush3.bf16.msra.mxu1 %v410_v18  ;;  %v404_v40 = vpack.c.bf16 %v76_v39, %v75_v38  ;;  %v60_v41 = vld [vmem:[#allocation2] sm:$0xff]  ;;  %v168_v46 = vld [vmem:[#allocation7 + $0x68] sm:$0xff]  ;;  %v169_v48 = vld [vmem:[#allocation7 + $0x70] sm:$0xff] }
  0x41   :  { %412 = vmatprep.subr.bf16.mxu1 %v542_v0  ;;  %v166_v43 = vld [vmem:[#allocation7 + $0x58] sm:$0xff]  ;;  %v425_v47 = vpack.c.bf16 %v168_v46, %v167_v45  ;;  %vm252_vm3 = vmand %vm250_vm1, %vm251_vm2 }
  0x42   :  { %390 = vmatpush3.bf16.msra.mxu0 %v389_v14  ;;  %v422_v44 = vpack.c.bf16 %v166_v43, %v165_v42  ;;  %v170_v49 = vld [vmem:[#allocation7 + $0x78] sm:$0xff] }
  0x43   :  { %391 = vmatprep.subr.bf16.mxu0 %v542_v0  ;;  %v428_v50 = vpack.c.bf16 %v170_v49, %v169_v48  ;;  %v276_v51 = vld [vmem:[%s654_s2] ss:$0 sm:$0xff]  ;;  %s545_s2 = smov [#allocation8]  }
  0x44   :  { %414 = vmatpush3.bf16.msra.mxu1 %v413_v24  ;;  %v277_v58 = vld [vmem:[%s656_s4] ss:$0 sm:$0xff]  ;;  %s266_s7 = sshll.u32 %s545_s2, 4  ;;  %s267_s7 = int_to_ptr.vmem [resolvable:$true] %s266_s7 }
  0x45   :  { %415 = vmatprep.subr.bf16.mxu1 %v542_v0  ;;  %s509_s8 = scalar_lea.vmem %s267_s7, 128  ;;  %p514_p11 = scmp.lt.s32.totalorder %s267_s7, %s267_s7 }
  0x46   :  { %393 = vmatpush3.bf16.msra.mxu0 %v392_v21  ;;  %p510_p10 = scmp.ne.s32.totalorder %s267_s7, %s509_s8  ;;  %p515_p12 = scmp.lt.s32.totalorder %s509_s8, %s509_s8 }
  0x47   :  { %394 = vmatprep.subr.bf16.mxu0 %v542_v0 }
  0x48   :  { %417 = vmatpush3.bf16.msra.mxu1 %v416_v30  ;;  %p516_p13 = por %p515_p12, %p514_p11 }
  0x49   :  { %418 = vmatprep.subr.bf16.mxu1 %v542_v0 }
  0x4a   :  { %396 = vmatpush3.bf16.msra.mxu0 %v395_v27  ;;  %p517_p0 = pnand %p516_p13, %p510_p10 }
  0x4b   :  { %397 = vmatprep.subr.bf16.mxu0 %v542_v0 }
  0x4c   :  { %420 = vmatpush3.bf16.msra.mxu1 %v419_v36 }
  0x4d   :  { %421 = vmatprep.subr.bf16.mxu1 %v542_v0 }
  0x4e   :  { %399 = vmatpush3.bf16.msra.mxu0 %v398_v33 }
  0x4f   :  { %400 = vmatprep.subr.bf16.mxu0 %v542_v0 }
  0x50   :  { %423 = vmatpush3.bf16.msra.mxu1 %v422_v44 }
  0x51   :  { %424 = vmatprep.subr.bf16.mxu1 %v542_v0 }
  0x52   :  { %402 = vmatpush3.bf16.msra.mxu0 %v401_v37 }
  0x53   :  { %403 = vmatprep.subr.bf16.mxu0 %v542_v0 }
  0x54   :  { %426 = vmatpush3.bf16.msra.mxu1 %v425_v47 }
  0x55   :  { %427 = vmatprep.subr.bf16.mxu1 %v542_v0 }
  0x56   :  { %405 = vmatpush3.bf16.msra.mxu0 %v404_v40 }
  0x58   :  { %429 = vmatpush3.bf16.msra.mxu1 %v428_v50 }
  0x59   :  { %345 = vmatmul.mubr.f32.vlgmr.msra.gmra.mrb[0].mxu0 %v60_v41 }
 0x12c   :  { %v150_v52 = vpop.f32.mrb[0].mxu0 }
 0x12d   :  { %v151_v53 = vadd.f32 %v276_v51, %v150_v52  ;;  %v346_v54 = vpop.f32.mrb[1].mxu0 }
 0x12f   :  { %439 = vtanh.f32 %v151_v53 }
 0x139   :  { %v440_v55 = vpop.eup %439 }
 0x13a   :  { %380 = vmatmul.mubr.f32.vlgmr.msra.gmra.mrb[0].mxu1 %v440_v55 }
 0x20d   :  { %v244_v59 = vpop.f32.mrb[0].mxu1 }
 0x20e   :  { %v245_v60 = vadd.f32 %v277_v58, %v244_v59  ;;  %v381_v61 = vpop.f32.mrb[1].mxu1 }
 0x210   :  { %v255_v62 = vsel %vm252_vm3, %v245_v60, 0.0 }
 0x211   :  { %v256_v63 = vmul.f32 1.442695, %v255_v62 }
 0x213   :  { %441 = vpow2.f32 %v256_v63 }
 0x21d   :  { %v442_v0 = vpop.eup %441 }
 0x21e   :  { %v258_v1 = vsel %vm252_vm3, %v442_v0, %v245_v60 }
 0x21f   :  { %259 = vst [vmem:[#allocation8] sm:$0xff] %v258_v1 }
 0x220   :  { %520 = shalt.err (!%p517_p0)
}
 0x221   :  { %s521_s10 = scalar_lea.hbm %s657_s5, 128 }
 0x222   :  { %p522_p1 = scmp.ne.s32.totalorder %s657_s5, %s521_s10  ;;  %p525_p2 = scmp.lt.u32.totalorder %s521_s10, %s657_s5 }
 0x224   :  { %p527_p3 = pnand %p525_p2, %p522_p1 }
 0x226   :  { %530 = shalt.err (!%p527_p3)
}
 0x227   :  { %269 = dma.vmem_to_hbm [thread:$0]  %s267_s7, 128, %s657_s5, [#allocation4]  }
 0x228   :  { %535 = dma.done.wait [#allocation4], 128  }
 0x229   :  { %536 = vsyncadd [#allocation4], 4294967168 }
 0x22a   :  { %273 = vsyncpa [#allocation3], 1 }
 0x22b   :  { %274 = vsyncpa [#allocation6], 1 }
 0x22c   :  { %275 = vsyncpa [#allocation4], 1 }

</bundles_post_ra>
